<compile_context>
chip_gen: v7x
topology: tpu7x:2x2x1
jax: 0.10.0
libtpu: 0.0.40
codegen_flags: <defaults>
</compile_context>

<pallas_src>
import jax
import jax.numpy as jnp
from jax import lax
from jax.experimental import pallas as pl
from jax.experimental.pallas import tpu as pltpu


def _make_resample_kernel(H, W, HWp, T, C, Cp, ncorner, sx, sy, horiz_only):
    inv_w = 1.0 / float(W)

    def kernel(lhs_ref, flow_ref, o_ref):
        # lhs_ref : (1, ncorner*Cp, HWp) bf16 -- image + corner-shifted copies
        # flow_ref: (1, Fc, T) f32            -- absolute-pixel flow tile
        # o_ref   : (1, C, T)
        t = pl.program_id(1)
        p = t * T + lax.broadcasted_iota(jnp.int32, (1, T), 1)   # flat out pixel
        pf = p.astype(jnp.float32)

        # Exact row/col split in f32 (exact for H*W <= 2**22, asserted outside).
        rowf = jnp.floor((pf + 0.5) * inv_w)
        colf = pf - rowf * W

        fx = flow_ref[0, 0:1, :].astype(jnp.float32)
        x = jnp.clip(colf + fx * sx, 0.0, W - 1.0)
        if horiz_only:
            y = jnp.clip(rowf, 0.0, H - 1.0)
        else:
            fy = flow_ref[0, 1:2, :].astype(jnp.float32)
            y = jnp.clip(rowf + fy * sy, 0.0, H - 1.0)

        x0 = jnp.floor(x)
        y0 = jnp.floor(y)
        dx = x - x0
        dy = y - y0

        # Flat source index of the top-left corner; exact integer-valued f32.
        q00i = (y0 * W + x0).astype(jnp.int32)                    # (1, T)

        # Single 0/1 gather mask; 0/1 is exact in bf16.
        q_iota = lax.broadcasted_iota(jnp.int32, (HWp, T), 0)
        mask = jnp.where(q_iota == q00i, 1.0, 0.0).astype(jnp.bfloat16)

        # One bf16 MXU contraction gathers all corners for all channels.
        gathered = jnp.dot(lhs_ref[0], mask,
                           preferred_element_type=jnp.float32)    # (ncorner*Cp, T)

        # Bilinear weights applied post-matmul in f32 on the VPU (O(C*T)).
        weights = [(1.0 - dy) * (1.0 - dx), (1.0 - dy) * dx]
        if not horiz_only:
            weights += [dy * (1.0 - dx), dy * dx]

        out = gathered[0:C] * weights[0]
        for k in range(1, ncorner):
            out = out + gathered[k * Cp:k * Cp + C] * weights[k]
        o_ref[0] = out.astype(o_ref.dtype)

    return kernel


def resample2d(images, flow, *, horiz_only=False, size=None, tile_out=None):
    """Pallas equivalent of Resample2d.forward (NCHW images, absolute-pixel flow)."""
    N, C, H, W = (int(s) for s in images.shape)
    Nf, Fc, Hf, Wf = (int(s) for s in flow.shape)
    assert Nf == N and Hf == H and Wf == W, "flow must match images spatially"
    assert Fc >= (1 if horiz_only else 2), "flow needs >= 2 channels unless horiz_only"
    if size is not None:
        Hn, Wn = int(size[0]), int(size[1])
    else:
        Hn, Wn = H, W
    assert Hn > 1 and Wn > 1, "degenerate 1-pixel normalisation (divide by zero)"
    HW = H * W
    assert HW <= (1 << 22), "in-kernel f32 row/col split exact only up to 4M pixels"
    dtype = images.dtype

    sx = float(W) / float(Wn - 1)
    sy = float(H) / float(Hn - 1)

    # ---- tiling over the flattened, lane-dense output-pixel axis -------------
    hw128 = -(-HW // 128) * 128
    T = min(hw128, 512) if tile_out is None else int(tile_out)
    assert T % 128 == 0, "tile_out must be a multiple of 128 lanes"
    T = min(T, hw128)
    HWp = -(-HW // T) * T                 # padded pixel count (multiple of T, 128)
    nt = HWp // T

    corner_offsets = (0, 1) if horiz_only else (0, 1, W, W + 1)
    ncorner = len(corner_offsets)
    Fc_used = 1 if horiz_only else 2
    Cp = -(-C // 8) * 8                   # per-corner channel block, sublane aligned

    # ---- wrapper-side prep: pad, flatten, stack corner-shifted copies --------
    img_flat = images.reshape(N, C, HW).astype(jnp.float32)
    flow_flat = flow[:, :Fc_used].reshape(N, Fc_used, HW).astype(jnp.float32)
    pad = HWp - HW
    if pad:
        img_flat = jnp.pad(img_flat, ((0, 0), (0, 0), (0, pad)))
        flow_flat = jnp.pad(flow_flat, ((0, 0), (0, 0), (0, pad)))

    shifted = [jnp.roll(img_flat, -off, axis=2) for off in corner_offsets]
    if Cp != C:
        shifted = [jnp.pad(s, ((0, 0), (0, Cp - C), (0, 0))) for s in shifted]
    lhs = jnp.concatenate(shifted, axis=1).astype(jnp.bfloat16)   # (N, ncorner*Cp, HWp)

    kernel = _make_resample_kernel(H, W, HWp, T, C, Cp, ncorner, sx, sy, horiz_only)

    # Explicit VMEM budget: blocks are double-buffered; mask/iota/select live once.
    lhs_bytes = ncorner * Cp * HWp * 2
    flow_bytes = Fc_used * T * 4
    out_bytes = C * T * jnp.dtype(dtype).itemsize
    mask_bytes = HWp * T * (4 + 4 + 2)        # i32 iota + f32 select + bf16 mask
    est = 2 * (lhs_bytes + flow_bytes + out_bytes) + mask_bytes + ncorner * Cp * T * 4
    vmem_limit = int(min(48 * 1024 * 1024, max(32 * 1024 * 1024, 2 * est)))

    out_flat = pl.pallas_call(
        kernel,
        out_shape=jax.ShapeDtypeStruct((N, C, HWp), dtype),
        grid_spec=pltpu.PrefetchScalarGridSpec(
            num_scalar_prefetch=0,
            grid=(N, nt),
            in_specs=[
                # Stacked image: index_map constant over the tile axis => resident.
                pl.BlockSpec((1, ncorner * Cp, HWp), lambda b, t: (b, 0, 0)),
                # Flow tile for the current output pixels.
                pl.BlockSpec((1, Fc_used, T), lambda b, t: (b, 0, t)),
            ],
            out_specs=pl.BlockSpec((1, C, T), lambda b, t: (b, 0, t)),
        ),
        compiler_params=pltpu.CompilerParams(
            dimension_semantics=("parallel", "parallel"),
            vmem_limit_bytes=vmem_limit,
        ),
    )(lhs, flow_flat)

    return out_flat[:, :, :HW].reshape(N, C, H, W)


def _reference_resample2d(images, flow, *, horiz_only=False, size=None,
                          gather_dtype=jnp.float32):
    """Pure-JAX reference with the PyTorch Resample2d semantics.

    gather_dtype=jnp.bfloat16 reproduces the kernel's bf16 image gather exactly
    (weights stay f32), enabling a tight correctness check."""
    N, C, H, W = images.shape
    Hn, Wn = (size if size is not None else (H, W))
    sx = float(W) / float(Wn - 1)
    sy = float(H) / float(Hn - 1)
    col = jnp.arange(W, dtype=jnp.float32)[None, None, :]
    row = jnp.arange(H, dtype=jnp.float32)[None, :, None]
    x = col + flow[:, 0].astype(jnp.float32) * sx
    if horiz_only:
        y = jnp.broadcast_to(row, (N, H, W))
    else:
        y = row + flow[:, 1].astype(jnp.float32) * sy
    x = jnp.clip(x, 0.0, W - 1.0)
    y = jnp.clip(y, 0.0, H - 1.0)
    x0 = jnp.floor(x); y0 = jnp.floor(y)
    dx = x - x0; dy = y - y0
    x0i = x0.astype(jnp.int32); y0i = y0.astype(jnp.int32)
    x1i = jnp.minimum(x0i + 1, W - 1)
    y1i = jnp.minimum(y0i + 1, H - 1)
    src = images.astype(gather_dtype).astype(jnp.float32).reshape(N, C, H * W)

    def gather(yi, xi):
        idx = jnp.broadcast_to((yi * W + xi).reshape(N, 1, H * W), (N, C, H * W))
        return jnp.take_along_axis(src, idx, axis=2).reshape(N, C, H, W)

    out = (gather(y0i, x0i) * ((1.0 - dy) * (1.0 - dx))[:, None]
           + gather(y0i, x1i) * ((1.0 - dy) * dx)[:, None]
           + gather(y1i, x0i) * (dy * (1.0 - dx))[:, None]
           + gather(y1i, x1i) * (dy * dx)[:, None])
    return out.astype(images.dtype)


if __name__ == "__main__":
    key = jax.random.PRNGKey(0)
    k1, k2, k3 = jax.random.split(key, 3)

    N, C, H, W = 2, 4, 16, 16
    images = jax.random.normal(k1, (N, C, H, W), dtype=jnp.float32)
    # Absolute-pixel flow, a few pixels in magnitude (exercises the border clamp).
    flow = 3.0 * jax.random.normal(k2, (N, 2, H, W), dtype=jnp.float32)

    # tile_out=128 => two output tiles per image: exercises the tiled indexing.
    out = jax.block_until_ready(resample2d(images, flow, tile_out=128))
    assert out.shape == (N, C, H, W), out.shape

    # Tight check: reference mirrors the kernel's bf16 image gather exactly
    # (catches any indexing / tiling bug).
    ref_tight = _reference_resample2d(images, flow, gather_dtype=jnp.bfloat16)
    err_tight = float(jnp.max(jnp.abs(out - ref_tight)))
    assert jnp.allclose(out, ref_tight, atol=1e-4, rtol=1e-4), (
        "tight check failed, max abs err = %g" % err_tight)

    # Looser end-to-end check against the full-f32 PyTorch semantics
    # (only bf16 image rounding separates the two).
    ref_f32 = _reference_resample2d(images, flow, gather_dtype=jnp.float32)
    err_f32 = float(jnp.max(jnp.abs(out - ref_f32)))
    assert jnp.allclose(out, ref_f32, atol=3e-2, rtol=3e-2), (
        "loose check failed, max abs err = %g" % err_f32)

    # Stereo / horiz_only mode (1-channel disparity).
    disp = 2.0 * jax.random.normal(k3, (N, 1, H, W), dtype=jnp.float32)
    out_h = jax.block_until_ready(
        resample2d(images, disp, horiz_only=True, tile_out=128))
    ref_h = _reference_resample2d(images, disp, horiz_only=True,
                                  gather_dtype=jnp.bfloat16)
    assert jnp.allclose(out_h, ref_h, atol=1e-4, rtol=1e-4)

    print("KERNEL_OK")
</pallas_src>

<mosaic_0001>
module attributes {stable_mosaic.version = 11 : i64} {
  func.func @kernel(%arg0: i32, %arg1: i32, %arg2: memref<1x32x256xbf16, #tpu.memory_space<vmem>>, %arg3: memref<1x2x128xf32, #tpu.memory_space<vmem>>, %arg4: memref<1x4x128xf32, #tpu.memory_space<vmem>>) attributes {dimension_semantics = [#tpu.dimension_semantics<parallel>, #tpu.dimension_semantics<parallel>], iteration_bounds = array<i64: 2, 2>, scalar_prefetch = 0 : i64, scratch_operands = 0 : i64, tpu.core_type = #tpu.core_type<tc>, window_params = [{transform_indices = @transform_0, window_bounds = array<i64: 1, 32, 256>}, {transform_indices = @transform_1, window_bounds = array<i64: 1, 2, 128>}, {transform_indices = @transform_2, window_bounds = array<i64: 1, 4, 128>}]} {
    %c128_i32 = arith.constant 128 : i32
    %0 = arith.muli %arg1, %c128_i32 : i32
    %1 = tpu.iota {dimensions = array<i32: 1>} : vector<1x128xi32>
    %2 = vector.broadcast %0 : i32 to vector<1x128xi32>
    %3 = arith.addi %2, %1 : vector<1x128xi32>
    %4 = arith.sitofp %3 : vector<1x128xi32> to vector<1x128xf32>
    %cst = arith.constant 5.000000e-01 : f32
    %5 = vector.broadcast %cst : f32 to vector<1x128xf32>
    %6 = arith.addf %4, %5 : vector<1x128xf32>
    %cst_0 = arith.constant 6.250000e-02 : f32
    %7 = vector.broadcast %cst_0 : f32 to vector<1x128xf32>
    %8 = arith.mulf %6, %7 : vector<1x128xf32>
    %9 = math.floor %8 : vector<1x128xf32>
    %cst_1 = arith.constant 1.600000e+01 : f32
    %10 = vector.broadcast %cst_1 : f32 to vector<1x128xf32>
    %11 = arith.mulf %9, %10 : vector<1x128xf32>
    %12 = arith.subf %4, %11 : vector<1x128xf32>
    %c0 = arith.constant 0 : index
    %c0_2 = arith.constant 0 : index
    %c0_3 = arith.constant 0 : index
    %13 = vector.load %arg3[%c0, %c0_2, %c0_3] : memref<1x2x128xf32, #tpu.memory_space<vmem>>, vector<1x1x128xf32>
    %14 = vector.shape_cast %13 : vector<1x1x128xf32> to vector<1x128xf32>
    %cst_4 = arith.constant 1.06666672 : f32
    %15 = vector.broadcast %cst_4 : f32 to vector<1x128xf32>
    %16 = arith.mulf %14, %15 : vector<1x128xf32>
    %17 = arith.addf %12, %16 : vector<1x128xf32>
    %cst_5 = arith.constant 0.000000e+00 : f32
    %cst_6 = arith.constant 1.500000e+01 : f32
    %18 = vector.broadcast %cst_5 : f32 to vector<1x128xf32>
    %19 = arith.maximumf %18, %17 : vector<1x128xf32>
    %20 = vector.broadcast %cst_6 : f32 to vector<1x128xf32>
    %21 = arith.minimumf %20, %19 : vector<1x128xf32>
    %c0_7 = arith.constant 0 : index
    %c1 = arith.constant 1 : index
    %c0_8 = arith.constant 0 : index
    %22 = vector.load %arg3[%c0_7, %c1, %c0_8] : memref<1x2x128xf32, #tpu.memory_space<vmem>>, vector<1x1x128xf32>
    %23 = vector.shape_cast %22 : vector<1x1x128xf32> to vector<1x128xf32>
    %cst_9 = arith.constant 1.06666672 : f32
    %24 = vector.broadcast %cst_9 : f32 to vector<1x128xf32>
    %25 = arith.mulf %23, %24 : vector<1x128xf32>
    %26 = arith.addf %9, %25 : vector<1x128xf32>
    %cst_10 = arith.constant 0.000000e+00 : f32
    %cst_11 = arith.constant 1.500000e+01 : f32
    %27 = vector.broadcast %cst_10 : f32 to vector<1x128xf32>
    %28 = arith.maximumf %27, %26 : vector<1x128xf32>
    %29 = vector.broadcast %cst_11 : f32 to vector<1x128xf32>
    %30 = arith.minimumf %29, %28 : vector<1x128xf32>
    %31 = math.floor %21 : vector<1x128xf32>
    %32 = math.floor %30 : vector<1x128xf32>
    %33 = arith.subf %21, %31 : vector<1x128xf32>
    %34 = arith.subf %30, %32 : vector<1x128xf32>
    %cst_12 = arith.constant 1.600000e+01 : f32
    %35 = vector.broadcast %cst_12 : f32 to vector<1x128xf32>
    %36 = arith.mulf %32, %35 : vector<1x128xf32>
    %37 = arith.addf %36, %31 : vector<1x128xf32>
    %38 = arith.fptosi %37 : vector<1x128xf32> to vector<1x128xi32>
    %39 = tpu.iota {dimensions = array<i32: 0>} : vector<256x128xi32>
    %40 = vector.broadcast %38 : vector<1x128xi32> to vector<256x128xi32>
    %41 = arith.cmpi eq, %39, %40 : vector<256x128xi32>
    %cst_13 = arith.constant 1.000000e+00 : f32
    %cst_14 = arith.constant 0.000000e+00 : f32
    %42 = vector.broadcast %cst_13 : f32 to vector<256x128xf32>
    %43 = vector.broadcast %cst_14 : f32 to vector<256x128xf32>
    %44 = arith.select %41, %42, %43 : vector<256x128xi1>, vector<256x128xf32>
    %45 = arith.truncf %44 : vector<256x128xf32> to vector<256x128xbf16>
    %c0_15 = arith.constant 0 : index
    %c0_16 = arith.constant 0 : index
    %c0_17 = arith.constant 0 : index
    %46 = vector.load %arg2[%c0_15, %c0_16, %c0_17] : memref<1x32x256xbf16, #tpu.memory_space<vmem>>, vector<1x32x256xbf16>
    %47 = vector.shape_cast %46 : vector<1x32x256xbf16> to vector<32x256xbf16>
    %cst_18 = arith.constant dense<0.000000e+00> : vector<32x128xf32>
    %48 = tpu.matmul %47, %45, %cst_18 {dimension_numbers = #tpu.dot_dimension_numbers<[1], [0], [0], [1], [0, 0, 1, 1], [], []>} : vector<32x256xbf16>, vector<256x128xbf16>, vector<32x128xf32> -> vector<32x128xf32>
    %cst_19 = arith.constant 1.000000e+00 : f32
    %49 = vector.broadcast %cst_19 : f32 to vector<1x128xf32>
    %50 = arith.subf %49, %34 : vector<1x128xf32>
    %cst_20 = arith.constant 1.000000e+00 : f32
    %51 = vector.broadcast %cst_20 : f32 to vector<1x128xf32>
    %52 = arith.subf %51, %33 : vector<1x128xf32>
    %53 = arith.mulf %50, %52 : vector<1x128xf32>
    %cst_21 = arith.constant 1.000000e+00 : f32
    %54 = vector.broadcast %cst_21 : f32 to vector<1x128xf32>
    %55 = arith.subf %54, %34 : vector<1x128xf32>
    %56 = arith.mulf %55, %33 : vector<1x128xf32>
    %cst_22 = arith.constant 1.000000e+00 : f32
    %57 = vector.broadcast %cst_22 : f32 to vector<1x128xf32>
    %58 = arith.subf %57, %33 : vector<1x128xf32>
    %59 = arith.mulf %34, %58 : vector<1x128xf32>
    %60 = arith.mulf %34, %33 : vector<1x128xf32>
    %61 = vector.extract_strided_slice %48 {offsets = [0, 0], sizes = [4, 128], strides = [1, 1]} : vector<32x128xf32> to vector<4x128xf32>
    %62 = vector.broadcast %53 : vector<1x128xf32> to vector<4x128xf32>
    %63 = arith.mulf %61, %62 : vector<4x128xf32>
    %64 = vector.extract_strided_slice %48 {offsets = [8, 0], sizes = [4, 128], strides = [1, 1]} : vector<32x128xf32> to vector<4x128xf32>
    %65 = vector.broadcast %56 : vector<1x128xf32> to vector<4x128xf32>
    %66 = arith.mulf %64, %65 : vector<4x128xf32>
    %67 = arith.addf %63, %66 : vector<4x128xf32>
    %68 = vector.extract_strided_slice %48 {offsets = [16, 0], sizes = [4, 128], strides = [1, 1]} : vector<32x128xf32> to vector<4x128xf32>
    %69 = vector.broadcast %59 : vector<1x128xf32> to vector<4x128xf32>
    %70 = arith.mulf %68, %69 : vector<4x128xf32>
    %71 = arith.addf %67, %70 : vector<4x128xf32>
    %72 = vector.extract_strided_slice %48 {offsets = [24, 0], sizes = [4, 128], strides = [1, 1]} : vector<32x128xf32> to vector<4x128xf32>
    %73 = vector.broadcast %60 : vector<1x128xf32> to vector<4x128xf32>
    %74 = arith.mulf %72, %73 : vector<4x128xf32>
    %75 = arith.addf %71, %74 : vector<4x128xf32>
    %c0_23 = arith.constant 0 : index
    %c0_24 = arith.constant 0 : index
    %c0_25 = arith.constant 0 : index
    %76 = vector.load %arg4[%c0_23, %c0_24, %c0_25] : memref<1x4x128xf32, #tpu.memory_space<vmem>>, vector<1x4x128xf32>
    %77 = vector.shape_cast %76 : vector<1x4x128xf32> to vector<4x128xf32>
    %78 = vector.shape_cast %75 : vector<4x128xf32> to vector<1x4x128xf32>
    tpu.vector_store %arg4[%c0_23, %c0_24, %c0_25], %78 {strides = array<i32>} : memref<1x4x128xf32, #tpu.memory_space<vmem>>, vector<1x4x128xf32>,
    return
  }
  func.func @transform_0(%arg0: i32, %arg1: i32) -> (i32, i32, i32) {
    %c0_i32 = arith.constant 0 : i32
    %c0_i32_0 = arith.constant 0 : i32
    %c0_i32_1 = arith.constant 0 : i32
    return %arg0, %c0_i32, %c0_i32_0 : i32, i32, i32
  }
  func.func @transform_1(%arg0: i32, %arg1: i32) -> (i32, i32, i32) {
    %c0_i32 = arith.constant 0 : i32
    %c0_i32_0 = arith.constant 0 : i32
    return %arg0, %c0_i32, %arg1 : i32, i32, i32
  }
  func.func @transform_2(%arg0: i32, %arg1: i32) -> (i32, i32, i32) {
    %c0_i32 = arith.constant 0 : i32
    %c0_i32_0 = arith.constant 0 : i32
    return %arg0, %c0_i32, %arg1 : i32, i32, i32
  }
}

</mosaic_0001>

<bundles_post_ra>
// kernel: tpu_custom_call.1
= control target key start
LH: loop header
LB: loop body
LE: loop exit
PB: predicated region body
PF: predicated region fallthrough
CT: control target
= control target key end

     0   :  { %s1442_s0 = inlined_call_operand.hbm [shape: bf16[2,32,256], index: 0, kind: input, shape index: {}]   ;;  %s1443_s1 = inlined_call_operand.hbm [shape: f32[2,2,256], index: 1, kind: input, shape index: {}]   ;;  %s1444_s2 = inlined_call_operand.hbm [shape: f32[2,4,256], index: 2, kind: output, shape index: {}]  }
   0x1   :  { %1452 = sst [smem:[#allocation13_spill]] %s1442_s0 }
   0x2   :  { %7 = vsyncpa [#allocation3], 0 }
   0x3   :  { %9 = vsyncpa [#allocation3 + $0x1], 0 }
   0x4   :  { %10 = vsyncpa [#allocation6], 0 }
   0x5   :  { %12 = vsyncpa [#allocation6 + $0x1], 0 }
   0x6   :  { %13 = vsyncpa [#allocation4], 0 }
   0x7   :  { %15 = vsyncpa [#allocation4 + $0x1], 0  ;;  %s1018_s9 = smov 0   ;;  %s1020_s10 = smov 0  }
   0x8   :  { %s1022_s11 = smov 0   ;;  %s1024_s12 = smov 0  }
   0x9   :  { %s1026_s13 = smov 0   ;;  %s1028_s14 = smov 0  }
   0xa   :  { %s1030_s15 = smov 0   ;;  %s1032_s16 = smov 0  }
   0xb   :  { %s1034_s17 = smov 0   ;;  %s1036_s18 = smov 0  }
   0xc   :  { %s1038_s19 = smov 0  }
   0xd LB: > { %p47_p0 = scmp.ne.s32.totalorder %s975_s14, %s971_s13  ;;  %s40_s20 = sadd.s32 1, %s975_s14  ;;  %s995_s19 = sphi %s1038_s19, %s21_s19   ;;  %s991_s18 = sphi %s1036_s18, %s1480_s18   ;;  %s987_s17 = sphi %s1034_s17, %s1479_s17   ;;  %s983_s16 = sphi %s1032_s16, %s1478_s16   ;;  %s979_s15 = sphi %s1030_s15, %s1477_s15   ;;  %s975_s14 = sphi %s1028_s14, %s1476_s14   ;;  %s971_s13 = sphi %s1026_s13, %s1475_s13   ;;  %s967_s12 = sphi %s1024_s12, %s1474_s12   ;;  %s963_s11 = sphi %s1022_s11, %s1473_s11   ;;  %s959_s10 = sphi %s1020_s10, %s1472_s10   ;;  %s955_s9 = sphi %s1018_s9, %s1471_s9  }
   0xe   : > { %p1446_p1 = scmp.eq.s32.totalorder %s995_s19, 0  ;;  %p1445_p2 = scmp.lt.s32.totalorder %s995_s19, 4 }
   0xf   : > { %s133_s21 = sand.u32 1, %s975_s14   ;;  %s646_s23 = sshll.u32 %s991_s18, 9 }
  0x10   : > { %p49_p3 = por %p1446_p1, %p47_p0  ;;  %s594_s22 = sshll.u32 %s133_s21, 5 }
  0x11   : > { %s1453_s0 = sld [smem:[#allocation13_spill]]  ;;  %s137_s27 = scalar_lea.vmem [#allocation2], %s594_s22 }
  0x12   : > { %s144_s28 = sshll.u32 %s137_s27, 4  ;;  %p1091_p4 = pnand %p1445_p2, %p49_p3  ;;  %s1087_s28 = int_to_ptr.vmem [resolvable:$true] %s144_s28 }
  0x13   : > { %p600_p5 = scmp.ge.s32.totalorder %s995_s19, 1  ;;  %s1096_s30 = scalar_lea.sflag [#allocation3], %s133_s21 }
  0x14   : > { %p811_p7 = pneg %p1091_p4 }
  0x17   : > { %s1085_s26 = scalar_lea.hbm %s1453_s0, %s646_s23  ;;  %s814_s6 = scalar_lea.hbm %s1453_s0, 1024 }
  0x18   : > { %s809_s3 = scalar_lea.hbm %s1085_s26, 512  ;;  %p815_p10 = scmp.lt.u32.totalorder %s1085_s26, %s1453_s0 }
  0x19   : > { %p810_p6 = scmp.ne.s32.totalorder %s1085_s26, %s809_s3  ;;  %p816_p11 = scmp.lt.u32.totalorder %s814_s6, %s809_s3 }
  0x1a   : > { %p818_p13 = scmp.lt.u32.totalorder %s809_s3, %s1085_s26 }
  0x1b   : > { %p812_p8 = pnand %p811_p7, %p810_p6  ;;  %p817_p12 = por %p816_p11, %p815_p10 }
  0x1d   : > { %p813_p9 = pneg %p812_p8  ;;  %p819_p0 = por %p818_p13, %p817_p12 }
  0x1f   : > { %p820_p3 = pnand %p819_p0, %p813_p9 }
  0x21   : > { %823 = shalt.err (!%p820_p3)
}
  0x22   : > { %s824_s21 = scalar_lea.vmem %s1087_s28, 512  ;;  %s997_s22 = smov [#allocation2]  }
  0x23   : > { %p825_p6 = scmp.ne.s32.totalorder %s1087_s28, %s824_s21  ;;  %s829_s23 = sshll.u32 %s997_s22, 4  ;;  %s830_s23 = int_to_ptr.vmem [resolvable:$false] %s829_s23 }
  0x24   : > { %s831_s24 = scalar_lea.vmem %s830_s23, 1024  ;;  %p832_p1 = scmp.lt.s32.totalorder %s1087_s28, %s830_s23 }
  0x25   : > { %p827_p8 = pnand %p825_p6, %p811_p7  ;;  %p833_p10 = scmp.lt.s32.totalorder %s831_s24, %s824_s21 }
  0x27   : > { %p828_p2 = pneg %p827_p8  ;;  %p834_p11 = por %p833_p10, %p832_p1 }
  0x29   : > { %p835_p12 = pnand %p834_p11, %p828_p2 }
  0x2b   : > { %838 = shalt.err (!%p835_p12)
}
  0x2c   : > { %s998_s25 = smov 128   ;;  %s999_s27 = smov 8  }
  0x2d   : > { %702 = dma.hbm_to_vmem [thread:$0]  (!%p1091_p4), %s1085_s26, 512, %s1087_s28, %s1096_s30, %s998_s25, %s998_s25, %s999_s27  }
  0x2e   : > { %p172_p1 = scmp.lt.s32.totalorder %s995_s19, 5  ;;  %p53_p7 = scmp.ne.s32.totalorder %s971_s13, %s967_s12 }
  0x2f   : > { %s590_s4 = sadd.s32 4294967295, %s995_s19   ;;  %s30_s5 = sadd.s32 1, %s987_s17 }
  0x30   : > { %p1127_p2 = pnand %p600_p5, %p172_p1  ;;  %s33_s6 = sadd.s32 1, %s991_s18 }
  0x31   : > { %p31_p9 = scmp.ge.s32.totalorder %s30_s5, 2  ;;  %p54_p13 = scmp.eq.s32.totalorder %s590_s4, 0 }
  0x32   : > { %s591_s29 = sadd.s32 4294967294, %s995_s19   ;;  %s68_s26 = sadd.s32 1, %s963_s11 }
  0x33   : > { %s1482_s5 = smov (%p31_p9, %s30_s5), 0  ;;  %s1484_s6 = smov (!%p31_p9, %s33_s6), %s991_s18 }
  0x34   : > { %1456 = sst [smem:[#allocation11_spill]] %s1482_s5  ;;  %p1141_p4 = por %p54_p13, %p53_p7 }
  0x35   : > { %p75_p5 = scmp.ne.s32.totalorder %s963_s11, %s959_s10  ;;  %p35_p0 = scmp.ge.s32.totalorder %s1484_s6, 2 }
  0x36   : > { %s1457_s28 = scalar_select %p1141_p4, 1, 0 }
  0x37   : > { %s64_s12 = ssub.s32 %s987_s17, %s1482_s5  ;;  %p81_p3 = scmp.ne.s32.totalorder %s959_s10, %s955_s9 }
  0x38   : > { %p107_p6 = scmp.eq.s32.totalorder %s590_s4, 3  ;;  %s1486_s6 = smov (%p35_p0, %s1484_s6), 0 }
  0x39   : > { %1458 = sst [smem:[#allocation12_spill]] %s1486_s6  ;;  %p1153_p8 = por %p81_p3, %p54_p13 }
  0x3a   : > { %p1160_p10 = por %p107_p6, %p75_p5  ;;  %s37_s8 = ssub.s32 %s991_s18, %s1486_s6 }
  0x3b   : > { %s1459_s30 = scalar_select %p1153_p8, 1, 0 }
  0x3c   : > { %s1460_s7 = scalar_select %p1160_p10, 1, 0 }
  0x3d   : > { %p113_p11 = scmp.eq.s32.totalorder %s591_s29, 3  ;;  %p38_p12 = scmp.eq.s32.totalorder %s37_s8, 0 }
  0x3e   : > { %s65_s21 = sor.u32 %s64_s12, %s37_s8  ;;  %s154_s25 = sand.u32 1, %s963_s11  }
  0x3f   : > { %p66_p1 = scmp.eq.s32.totalorder %s65_s21, 0  ;;  %p1166_p7 = por %p113_p11, %p81_p3 }
  0x40   : > { %s1173_s23 = scalar_select %p38_p12, %s975_s14, %s40_s20  }
  0x41   : > { %s1461_s22 = scalar_select %p1166_p7, 1, 0 }
  0x42   : > { %s1176_s24 = scalar_select %p66_p1, %s963_s11, %s68_s26  }
  0x43   : > { %s598_s27 = sshll.u32 %s991_s18, 1  ;;  %p1462_p9 = scmp.eq.s32.totalorder %s995_s19, 0 }
  0x44   : > { %s597_s4 = sshll.u32 %s154_s25, 1  ;;  %s163_s29 = sadd.s32 %s987_s17, %s598_s27 }
  0x45   : > { %p77_p13 = por %p75_p5, %p1462_p9  ;;  %s599_s0 = sshll.u32 %s163_s29, 5 }
  0x46   : > { %s158_s6 = scalar_lea.vmem [#allocation5], %s597_s4  ;;  %s1189_s5 = scalar_lea.hbm %s1443_s1, %s599_s0 }
  0x47   : > { %s167_s12 = sshll.u32 %s158_s6, 4  ;;  %p1463_p0 = scmp.lt.s32.totalorder %s995_s19, 4  ;;  %s1191_s12 = int_to_ptr.vmem [resolvable:$true] %s167_s12 }
  0x48   : > { %s155_s26 = scalar_lea.sflag [#allocation6], %s154_s25  ;;  %s839_s6 = scalar_lea.hbm %s1189_s5, 32 }
  0x49   : > { %p1195_p3 = pnand %p1463_p0, %p77_p13  ;;  %p840_p5 = scmp.ne.s32.totalorder %s1189_s5, %s839_s6 }
  0x4a   : > { %s844_s4 = scalar_lea.hbm %s1443_s1, 128  ;;  %p845_p1 = scmp.lt.u32.totalorder %s1189_s5, %s1443_s1 }
  0x4b   : > { %p841_p6 = pneg %p1195_p3  ;;  %p846_p9 = scmp.lt.u32.totalorder %s844_s4, %s839_s6 }
  0x4c   : > { %p848_p0 = scmp.lt.u32.totalorder %s839_s6, %s1189_s5 }
  0x4d   : > { %p842_p11 = pnand %p841_p6, %p840_p5  ;;  %p847_p13 = por %p846_p9, %p845_p1 }
  0x4f   : > { %p843_p12 = pneg %p842_p11  ;;  %p849_p7 = por %p848_p0, %p847_p13 }
  0x51   : > { %p850_p10 = pnand %p849_p7, %p843_p12 }
  0x53   : > { %853 = shalt.err (!%p850_p10)
}
  0x54   : > { %s854_s25 = scalar_lea.vmem %s1191_s12, 32  ;;  %s1000_s21 = smov [#allocation5]  }
  0x55   : > { %p855_p5 = scmp.ne.s32.totalorder %s1191_s12, %s854_s25  ;;  %s859_s0 = sshll.u32 %s1000_s21, 4  ;;  %s860_s0 = int_to_ptr.vmem [resolvable:$false] %s859_s0 }
  0x56   : > { %s861_s27 = scalar_lea.vmem %s860_s0, 64  ;;  %p862_p4 = scmp.lt.s32.totalorder %s1191_s12, %s860_s0 }
  0x57   : > { %p857_p11 = pnand %p855_p5, %p841_p6  ;;  %p863_p1 = scmp.lt.s32.totalorder %s861_s27, %s854_s25 }
  0x59   : > { %p858_p8 = pneg %p857_p11  ;;  %p864_p9 = por %p863_p1, %p862_p4 }
  0x5b   : > { %p865_p13 = pnand %p864_p9, %p858_p8 }
  0x5d   : > { %868 = shalt.err (!%p865_p13)
}
  0x5e   : > { %705 = dma.hbm_to_vmem [thread:$0]  (!%p1195_p3), %s1189_s5, 32, %s1191_s12, %s155_s26  }
  0x5f   : > { %176 = sbr.rel (%p1127_p2) target bundleno = 414 (0x19e), region = 28  ;;  %s178_s6 = sand.u32 (!%p1127_p2), 1, %s971_s13  }
  0x60   : > { %s601_s4 = sshll.u32 (!%p1127_p2), %s178_s6, 5  ;;  %s179_s29 = scalar_lea.sflag (!%p1127_p2), [#allocation3], %s178_s6 }
  0x61   : > { %s1227_s8 = scalar_lea.vmem (!%p1127_p2), [#allocation2], %s601_s4  ;;  %p1465_p10 = scmp.ne.s32.totalorder (!%p1127_p2), %s1457_s28, 0 }
  0x66   : > { %942 = dma.done.wait (%p1465_p10), %s179_s29, 512  }
  0x67   : > { %944 = vsyncadd (%p1465_p10), %s179_s29, 4294966784  ;;  %s1234_s20 = sand.u32 1, %s959_s10   ;;  %p1466_p2 = scmp.ne.s32.totalorder %s1459_s30, 0 }
  0x68   : > { %s602_s3 = sshll.u32 %s1234_s20, 1  ;;  %s188_s5 = scalar_lea.sflag [#allocation6], %s1234_s20 }
  0x69   : > { %s191_s12 = scalar_lea.vmem [#allocation5], %s602_s3 }
  0x6a   : > { %946 = dma.done.wait (%p1466_p2), %s188_s5, 32  }
  0x6b   : > { %948 = vsyncadd (%p1466_p2), %s188_s5, 4294967264  ;;  %s604_s26 = sshll.u32 %s979_s15, 7  ;;  %v219_v0 = vlaneseq  ;;  %v234_v5 = vld [vmem:[%s191_s12 + $0x1] sm:$0x1]  ;;  %v229_v9 = vld [vmem:[%s191_s12] sm:$0x1] }
  0x6c   : > { %v221_v1 = vstv %s604_s26  ;;  %v235_v8 = vmul.f32 1.0666667, %v234_v5  ;;  %v805_v10 = vld [vmem:[%s1227_s8 + $0x4] ss:$8 sps:$4 sm:$0xff]   ;;  %v230_v13 = vmul.f32 1.0666667, %v229_v9 }
  0x6d   : > { %v220_v2 = vand.u32 127, %v219_v0  ;;  %419 = vmatprep.mubr.bf16.mxu0 %v805_v10  ;;  %v808_v15 = vld [vmem:[%s1227_s8 + $0x14] ss:$8 sps:$4 sm:$0xff]   ;;  %v1253_v25 = vshrl.u32 %v219_v0, 7  ;;  %v1001_v42 = vmov 1.0|1.0  }
  0x6e   : > { %427 = vmatprep.mubr.bf16.mxu1 %v808_v15  ;;  %v803_v63 = vld [vmem:[%s1227_s8] ss:$8 sps:$4 sm:$0xff]   ;;  %v806_v0 = vld [vmem:[%s1227_s8 + $0x10] ss:$8 sps:$4 sm:$0xff]   ;;  %s603_s28 = sshll.u32 %s1234_s20, 2  ;;  %s642_s30 = sshll.u32 %s983_s16, 1 }
  0x6f   : > { %v222_v3 = vadd.s32 %v221_v1, %v220_v2  ;;  %v1258_v28 = vsub.s32 0, %v1253_v25  ;;  %v263_v30 = vadd.s32 128, %v1253_v25  ;;  %v264_v31 = vadd.s32 136, %v1253_v25  ;;  %s478_s25 = sadd.s32 %s979_s15, %s642_s30  ;;  %s216_s0 = scalar_lea.vmem [#allocation7], %s603_s28 }
  0x70   : > { %v248_v32 = vadd.s32 8, %v1253_v25  ;;  %v265_v33 = vadd.s32 144, %v1253_v25  ;;  %v266_v34 = vadd.s32 152, %v1253_v25  ;;  %v249_v35 = vadd.s32 16, %v1253_v25  ;;  %s643_s21 = sshll.u32 %s478_s25, 6  ;;  %s482_s27 = sshll.u32 %s216_s0, 4  ;;  %s1381_s27 = int_to_ptr.vmem [resolvable:$true] %s482_s27 }
  0x71   : > { %v223_v4 = vcvt.s32.f32 %v222_v3  ;;  %v250_v36 = vadd.s32 24, %v1253_v25  ;;  %v267_v38 = vadd.s32 160, %v1253_v25  ;;  %v268_v39 = vadd.s32 168, %v1253_v25  ;;  %s1379_s16 = scalar_lea.hbm %s1444_s2, %s643_s21  ;;  %s467_s29 = scalar_lea.sflag [#allocation4], %s1234_s20 }
  0x72   : > { %v251_v40 = vadd.s32 32, %v1253_v25  ;;  %v252_v41 = vadd.s32 40, %v1253_v25  ;;  %v269_v43 = vadd.s32 176, %v1253_v25  ;;  %v270_v44 = vadd.s32 184, %v1253_v25  ;;  %s869_s15 = scalar_lea.vmem %s1381_s27, 64  ;;  %p1467_p8 = scmp.ne.s32.totalorder %s1460_s7, 0 }
  0x73   : > { %v224_v6 = vadd.f32 0.5, %v223_v4  ;;  %v253_v45 = vadd.s32 48, %v1253_v25  ;;  %v254_v46 = vadd.s32 56, %v1253_v25  ;;  %v271_v47 = vadd.s32 192, %v1253_v25  ;;  %p870_p4 = scmp.ne.s32.totalorder %s1381_s27, %s869_s15  ;;  %s1002_s8 = smov [#allocation7]  }
  0x74   : > { %v272_v48 = vadd.s32 200, %v1253_v25  ;;  %v255_v49 = vadd.s32 64, %v1253_v25  ;;  %v256_v50 = vadd.s32 72, %v1253_v25  ;;  %v273_v51 = vadd.s32 208, %v1253_v25  ;;  %s873_s3 = sshll.u32 %s1002_s8, 4  ;;  %s874_s3 = int_to_ptr.vmem [resolvable:$false] %s873_s3 }
  0x75   : > { %v225_v7 = vmul.f32 0.0625, %v224_v6  ;;  %v274_v52 = vadd.s32 216, %v1253_v25  ;;  %v257_v53 = vadd.s32 80, %v1253_v25  ;;  %v258_v54 = vadd.s32 88, %v1253_v25  ;;  %p871_p7 = pnand %p870_p4, %p1467_p8  ;;  %s875_s5 = scalar_lea.vmem %s874_s3, 128 }
  0x76   : > { %v275_v55 = vadd.s32 224, %v1253_v25  ;;  %v276_v56 = vadd.s32 232, %v1253_v25  ;;  %v259_v57 = vadd.s32 96, %v1253_v25  ;;  %v260_v58 = vadd.s32 104, %v1253_v25  ;;  %p876_p6 = scmp.lt.s32.totalorder %s1381_s27, %s874_s3  ;;  %p877_p12 = scmp.lt.s32.totalorder %s875_s5, %s869_s15 }
  0x77   : > { %v226_v11 = vfloor.f32 %v225_v7  ;;  %v277_v59 = vadd.s32 240, %v1253_v25  ;;  %v278_v60 = vadd.s32 248, %v1253_v25  ;;  %v261_v61 = vadd.s32 112, %v1253_v25  ;;  %p872_p3 = pneg %p871_p7 }
  0x78   : > { %v262_v62 = vadd.s32 120, %v1253_v25  ;;  %p878_p0 = por %p877_p12, %p876_p6 }
  0x79   : > { %v227_v12 = vmul.f32 16.0, %v226_v11  ;;  %v236_v14 = vadd.f32 %v235_v8, %v226_v11 }
  0x7a   : > { %p879_p5 = pnand %p878_p0, %p872_p3 }
  0x7b   : > { %v228_v16 = vsub.f32 %v223_v4, %v227_v12  ;;  %v237_v17 = vmax.f32 %v236_v14, 0.0 }
  0x7d   : > { %v231_v18 = vadd.f32 %v230_v13, %v228_v16  ;;  %v1245_v19 = vmin.f32 %v237_v17, 15.0 }
  0x7f   : > { %v232_v20 = vmax.f32 %v231_v18, 0.0  ;;  %v240_v21 = vfloor.f32 %v1245_v19 }
  0x81   : > { %v1248_v22 = vmin.f32 %v232_v20, 15.0  ;;  %v243_v23 = vmul.f32 16.0, %v240_v21  ;;  %v242_v2 = vsub.f32 %v1245_v19, %v240_v21 }
  0x83   : > { %v239_v24 = vfloor.f32 %v1248_v22  ;;  %v436_v3 = vsub.f32 1.0, %v242_v2 }
  0x85   : > { %v244_v26 = vadd.f32 %v243_v23, %v239_v24  ;;  %v241_v1 = vsub.f32 %v1248_v22, %v239_v24 }
  0x87   : > { %v691_v27 = vtrunc.f32 %v244_v26  ;;  %v437_v4 = vsub.f32 1.0, %v241_v1  ;;  %v439_v7 = vmul.f32 %v436_v3, %v241_v1  ;;  %v441_v13 = vmul.f32 %v242_v2, %v241_v1 }
  0x89   : > { %v692_v29 = vcvt.f32.s32 %v691_v27  ;;  %v438_v5 = vmul.f32 %v437_v4, %v436_v3  ;;  %v440_v6 = vmul.f32 %v437_v4, %v242_v2  ;;  %v450_v18 = vrot.slane %v439_v7, %v1258_v28 }
  0x8a   : > { %v462_v27 = vrot.slane %v441_v13, %v1258_v28 }
  0x8b   : > { %v1268_v37 = vrot.slane %v692_v29, %v1258_v28  ;;  %v445_v11 = vrot.slane %v438_v5, %v1258_v28  ;;  %v456_v17 = vrot.slane %v440_v6, %v1258_v28 }
  0x8d   : > { %vm299_vm0 = vcmp.eq.s32.totalorder %v263_v30, %v1268_v37  ;;  %vm300_vm1 = vcmp.eq.s32.totalorder %v264_v31, %v1268_v37  ;;  %vm283_vm2 = vcmp.eq.s32.totalorder %v1253_v25, %v1268_v37  ;;  %vm284_vm3 = vcmp.eq.s32.totalorder %v248_v32, %v1268_v37 }
  0x8e   : > { %vm625_vm4 = vmpackc.low %vm300_vm1, %vm299_vm0  ;;  %vm301_vm5 = vcmp.eq.s32.totalorder %v265_v33, %v1268_v37  ;;  %vm302_vm6 = vcmp.eq.s32.totalorder %v266_v34, %v1268_v37  ;;  %vm285_vm7 = vcmp.eq.s32.totalorder %v249_v35, %v1268_v37  ;;  %vm286_vm8 = vcmp.eq.s32.totalorder %v250_v36, %v1268_v37 }
  0x8f   : > { %647 = vmatprep.subr.msk.bf16.mxu0 %vm625_vm4, %v1001_v42  ;;  %675 = vmatprep.subr.msk.bf16.mxu1 %vm625_vm4, %v1001_v42  ;;  %vm609_vm9 = vmpackc.low %vm284_vm3, %vm283_vm2  ;;  %vm303_vm10 = vcmp.eq.s32.totalorder %v267_v38, %v1268_v37  ;;  %vm304_vm11 = vcmp.eq.s32.totalorder %v268_v39, %v1268_v37  ;;  %vm287_vm15 = vcmp.eq.s32.totalorder %v251_v40, %v1268_v37 }
  0x90   : > { %648 = vmatpush3.bf16.msk.msra.mxu0 %vm609_vm9, %v1001_v42  ;;  %683 = vmatpush3.bf16.msk.msra.mxu1 %vm609_vm9, %v1001_v42  ;;  %vm627_vm12 = vmpackc.low %vm302_vm6, %vm301_vm5  ;;  %vm288_vm0 = vcmp.eq.s32.totalorder %v252_v41, %v1268_v37  ;;  %vm305_vm1 = vcmp.eq.s32.totalorder %v269_v43, %v1268_v37  ;;  %vm306_vm2 = vcmp.eq.s32.totalorder %v270_v44, %v1268_v37 }
  0x91   : > { %649 = vmatprep.subr.msk.bf16.mxu0 %vm627_vm12, %v1001_v42  ;;  %676 = vmatprep.subr.msk.bf16.mxu1 %vm627_vm12, %v1001_v42  ;;  %vm611_vm13 = vmpackc.low %vm286_vm8, %vm285_vm7  ;;  %vm289_vm5 = vcmp.eq.s32.totalorder %v253_v45, %v1268_v37  ;;  %vm290_vm6 = vcmp.eq.s32.totalorder %v254_v46, %v1268_v37  ;;  %vm307_vm7 = vcmp.eq.s32.totalorder %v271_v47, %v1268_v37 }
  0x92   : > { %vm629_vm14 = vmpackc.low %vm304_vm11, %vm303_vm10  ;;  %vm308_vm8 = vcmp.eq.s32.totalorder %v272_v48, %v1268_v37  ;;  %vm291_vm11 = vcmp.eq.s32.totalorder %v255_v49, %v1268_v37  ;;  %vm292_vm12 = vcmp.eq.s32.totalorder %v256_v50, %v1268_v37 }
  0x93   : > { %vm613_vm3 = vmpackc.low %vm288_vm0, %vm287_vm15 }
  0x94   : > { %650 = vmatpush3.bf16.msk.msra.mxu0 %vm611_vm13, %v1001_v42  ;;  %684 = vmatpush3.bf16.msk.msra.mxu1 %vm611_vm13, %v1001_v42  ;;  %vm631_vm4 = vmpackc.low %vm306_vm2, %vm305_vm1  ;;  %vm309_vm13 = vcmp.eq.s32.totalorder %v273_v51, %v1268_v37  ;;  %vm293_vm1 = vcmp.eq.s32.totalorder %v257_v53, %v1268_v37  ;;  %vm294_vm2 = vcmp.eq.s32.totalorder %v258_v54, %v1268_v37 }
  0x95   : > { %651 = vmatprep.subr.msk.bf16.mxu0 %vm629_vm14, %v1001_v42  ;;  %677 = vmatprep.subr.msk.bf16.mxu1 %vm629_vm14, %v1001_v42  ;;  %vm615_vm9 = vmpackc.low %vm290_vm6, %vm289_vm5  ;;  %vm310_vm14 = vcmp.eq.s32.totalorder %v274_v52, %v1268_v37 }
  0x96   : > { %vm633_vm10 = vmpackc.low %vm308_vm8, %vm307_vm7  ;;  %vm295_vm7 = vcmp.eq.s32.totalorder %v259_v57, %v1268_v37  ;;  %vm296_vm8 = vcmp.eq.s32.totalorder %v260_v58, %v1268_v37 }
  0x97   : > { %vm617_vm15 = vmpackc.low %vm292_vm12, %vm291_vm11 }
  0x98   : > { %652 = vmatpush3.bf16.msk.msra.mxu0 %vm613_vm3, %v1001_v42  ;;  %685 = vmatpush3.bf16.msk.msra.mxu1 %vm613_vm3, %v1001_v42  ;;  %vm635_vm0 = vmpackc.low %vm310_vm14, %vm309_vm13  ;;  %vm311_vm3 = vcmp.eq.s32.totalorder %v275_v55, %v1268_v37  ;;  %vm297_vm13 = vcmp.eq.s32.totalorder %v261_v61, %v1268_v37  ;;  %vm298_vm14 = vcmp.eq.s32.totalorder %v262_v62, %v1268_v37 }
  0x99   : > { %653 = vmatprep.subr.msk.bf16.mxu0 %vm631_vm4, %v1001_v42  ;;  %678 = vmatprep.subr.msk.bf16.mxu1 %vm631_vm4, %v1001_v42  ;;  %vm312_vm4 = vcmp.eq.s32.totalorder %v276_v56, %v1268_v37  ;;  %vm619_vm5 = vmpackc.low %vm294_vm2, %vm293_vm1 }
  0x9a   : > { %vm637_vm6 = vmpackc.low %vm312_vm4, %vm311_vm3 }
  0x9b   : > { %vm621_vm11 = vmpackc.low %vm296_vm8, %vm295_vm7 }
  0x9c   : > { %654 = vmatpush3.bf16.msk.msra.mxu0 %vm615_vm9, %v1001_v42  ;;  %686 = vmatpush3.bf16.msk.msra.mxu1 %vm615_vm9, %v1001_v42  ;;  %vm313_vm9 = vcmp.eq.s32.totalorder %v277_v59, %v1268_v37 }
  0x9d   : > { %655 = vmatprep.subr.msk.bf16.mxu0 %vm633_vm10, %v1001_v42  ;;  %679 = vmatprep.subr.msk.bf16.mxu1 %vm633_vm10, %v1001_v42  ;;  %vm314_vm10 = vcmp.eq.s32.totalorder %v278_v60, %v1268_v37 }
  0x9e   : > { %vm639_vm12 = vmpackc.low %vm314_vm10, %vm313_vm9 }
  0xa0   : > { %656 = vmatpush3.bf16.msk.msra.mxu0 %vm617_vm15, %v1001_v42  ;;  %687 = vmatpush3.bf16.msk.msra.mxu1 %vm617_vm15, %v1001_v42  ;;  %vm623_vm15 = vmpackc.low %vm298_vm14, %vm297_vm13 }
  0xa1   : > { %657 = vmatprep.subr.msk.bf16.mxu0 %vm635_vm0, %v1001_v42  ;;  %680 = vmatprep.subr.msk.bf16.mxu1 %vm635_vm0, %v1001_v42 }
  0xa4   : > { %658 = vmatpush3.bf16.msk.msra.mxu0 %vm619_vm5, %v1001_v42  ;;  %688 = vmatpush3.bf16.msk.msra.mxu1 %vm619_vm5, %v1001_v42 }
  0xa5   : > { %659 = vmatprep.subr.msk.bf16.mxu0 %vm637_vm6, %v1001_v42  ;;  %681 = vmatprep.subr.msk.bf16.mxu1 %vm637_vm6, %v1001_v42 }
  0xa8   : > { %660 = vmatpush3.bf16.msk.msra.mxu0 %vm621_vm11, %v1001_v42  ;;  %689 = vmatpush3.bf16.msk.msra.mxu1 %vm621_vm11, %v1001_v42 }
  0xa9   : > { %661 = vmatprep.subr.msk.bf16.mxu0 %vm639_vm12, %v1001_v42  ;;  %682 = vmatprep.subr.msk.bf16.mxu1 %vm639_vm12, %v1001_v42 }
  0xac   : > { %662 = vmatpush3.bf16.msk.msra.mxu0 %vm623_vm15, %v1001_v42  ;;  %690 = vmatpush3.bf16.msk.msra.mxu1 %vm623_vm15, %v1001_v42 }
  0xaf   : > { %420 = vmatmul.mubr.bf16.vlgmr.msra.gmra.mrb[0].mxu0 %v803_v63  ;;  %428 = vmatmul.mubr.bf16.vlgmr.msra.gmra.mrb[0].mxu1 %v806_v0 }
 0x182   : > { %v663_v8 = vpop.f32.mrb[0].mxu0  ;;  %v669_v9 = vpop.f32.mrb[0].mxu1 }
 0x183   : > { %v664_v10 = vpop.f32.mrb[1].mxu0  ;;  %v670_v12 = vpop.f32.mrb[1].mxu1 }
 0x184   : > { %v665_v14 = vadd.f32 %v664_v10, %v663_v8  ;;  %v666_v15 = vpop.f32.mrb[2].mxu0  ;;  %v671_v16 = vadd.f32 %v670_v12, %v669_v9  ;;  %v672_v19 = vpop.f32.mrb[2].mxu1 }
 0x185   : > { %v667_v20 = vpop.f32.mrb[3].mxu0  ;;  %v673_v21 = vpop.f32.mrb[3].mxu1 }
 0x186   : > { %v668_v22 = vadd.f32 %v667_v20, %v666_v15  ;;  %v674_v23 = vadd.f32 %v673_v21, %v672_v19  ;;  %v446_v24 = vmul.f32 %v665_v14, %v445_v11  ;;  %v457_v25 = vmul.f32 %v671_v16, %v456_v17 }
 0x188   : > { %v451_v26 = vmul.f32 %v668_v22, %v450_v18  ;;  %v463_v31 = vmul.f32 %v674_v23, %v462_v27 }
 0x18a   : > { %v452_v29 = vadd.f32 %v451_v26, %v446_v24 }
 0x18c   : > { %v458_v30 = vadd.f32 %v457_v25, %v452_v29 }
 0x18e   : > { %v464_v32 = vadd.f32 %v463_v31, %v458_v30 }
 0x190   : > { %465 = vst [vmem:[%s216_s0] sm:$0xf] %v464_v32 }
 0x191   : > { %882 = shalt.err (!%p879_p5)
}
 0x192   : > { %s883_s20 = scalar_lea.hbm %s1379_s16, 64  ;;  %s887_s28 = scalar_lea.hbm %s1444_s2, 256 }
 0x193   : > { %p884_p11 = scmp.ne.s32.totalorder %s1379_s16, %s883_s20  ;;  %p888_p13 = scmp.lt.u32.totalorder %s1379_s16, %s1444_s2 }
 0x194   : > { %p889_p10 = scmp.lt.u32.totalorder %s887_s28, %s883_s20  ;;  %p891_p4 = scmp.lt.u32.totalorder %s883_s20, %s1379_s16 }
 0x195   : > { %p885_p1 = pnand %p884_p11, %p1467_p8 }
 0x196   : > { %p890_p2 = por %p889_p10, %p888_p13 }
 0x197   : > { %p886_p9 = pneg %p885_p1 }
 0x198   : > { %p892_p7 = por %p891_p4, %p890_p2 }
 0x19a   : > { %p893_p3 = pnand %p892_p7, %p886_p9 }
 0x19c   : > { %896 = shalt.err (!%p893_p3)
}
 0x19d   : > { %697 = dma.vmem_to_hbm [thread:$0]  (%p1467_p8), %s1381_s27, 64, %s1379_s16, %s467_s29  }
 0x19e PF: > { %p711_p6 = scmp.ge.s32.totalorder %s995_s19, 2  ;;  %s494_s21 = sand.u32 1, %s955_s9  }
 0x19f   : > { %p1468_p12 = scmp.ne.s32.totalorder %s1461_s22, 0  ;;  %s495_s0 = scalar_lea.sflag [#allocation4], %s494_s21 }
 0x1a1   : > { %p707_p0 = pnand %p711_p6, %p1468_p12 }
 0x1a3   : > { %950 = dma.done.wait (!%p707_p0), %s495_s0, 64  }
 0x1a4   : > { %952 = vsyncadd (!%p707_p0), %s495_s0, 4294967232  ;;  %s21_s19 = sadd.s32 1, %s995_s19   ;;  %s1469_s7 = sld [smem:[#allocation11_spill]] }
 0x1a5   : > { %p18_p5 = scmp.ge.s32.totalorder %s21_s19, 6   ;;  %s1470_s27 = sld [smem:[#allocation12_spill]] }
 0x1a6   : > { %s1471_s9 = smov %s959_s10  ;;  %s1472_s10 = smov %s963_s11 }
 0x1a7   : > { %s1473_s11 = smov %s1176_s24  ;;  %s1474_s12 = smov %s971_s13 }
 0x1a8   : > { %s1475_s13 = smov %s975_s14  ;;  %s1476_s14 = smov %s1173_s23 }
 0x1a9   : > { %s1477_s15 = smov %s987_s17  ;;  %s1478_s16 = smov %s991_s18 }
 0x1aa   : > { %s1479_s17 = smov %s1469_s7  ;;  %20 = sbr.rel (!%p18_p5) target bundleno = 13 (0xd), region = 86 }
 0x1ab   : > { %s1480_s18 = smov %s1470_s27 }
 0x1b1   :  { %500 = vsyncpa [#allocation3], 1 }
 0x1b2   :  { %502 = vsyncpa [#allocation3 + $0x1], 1 }
 0x1b3   :  { %503 = vsyncpa [#allocation6], 1 }
 0x1b4   :  { %505 = vsyncpa [#allocation6 + $0x1], 1 }
 0x1b5   :  { %506 = vsyncpa [#allocation4], 1 }
 0x1b6   :  { %508 = vsyncpa [#allocation4 + $0x1], 1 }

</bundles_post_ra>
